<compile_context>
chip_gen: v7x
topology: tpu7x:2x2x1
jax: 0.10.0
libtpu: 0.0.40
codegen_flags: <defaults>
</compile_context>

<pallas_src>
import functools

import jax
import jax.numpy as jnp
from jax.experimental import pallas as pl
from jax.experimental.pallas import tpu as pltpu


def _gated_attn_kernel(x_ref, wab_ref, bab_ref, wc_ref, bc_ref, A_ref, *, D):
    x = x_ref[...]                                                     # (TN, L)

    # Fused attention_a / attention_b: one (TN, L) @ (L, 2D) MXU pass.
    y = jnp.dot(x, wab_ref[...],
                preferred_element_type=jnp.float32) + bab_ref[...]     # (TN, 2D) f32

    # NOTE: split at column D; keep D a multiple of 128 (lane-aligned split).
    a = jnp.tanh(y[:, :D])                                             # (TN, D)
    b = jax.nn.sigmoid(y[:, D:])                                       # (TN, D)
    ab = (a * b).astype(wc_ref.dtype)                                  # gate in f32, cast for MXU

    # attention_c: Linear(D, C) padded to a lane-dense C_pad output.
    A = jnp.dot(ab, wc_ref[...],
                preferred_element_type=jnp.float32) + bc_ref[...]      # (TN, C_pad)
    A_ref[...] = A.astype(A_ref.dtype)


def attn_net_gated(x, wa, ba, wb, bb, wc, bc, *, tn=512, matmul_dtype=None):
    """Gated attention head.

    x:  (N, L) float32
    wa, wb: (L, D)   ba, bb: (1, D)      (transpose of torch Linear weights)
    wc: (D, C)       bc: (1, C)
    tn: rows of x per grid step (multiple of 128 recommended).
    matmul_dtype: optional dtype (e.g. jnp.bfloat16) for MXU operands; the
      accumulation, bias add, tanh/sigmoid and gating stay in float32.

    Returns (A, x) like the PyTorch module.
    """
    N, L = x.shape
    D = wa.shape[1]
    C = wc.shape[1]

    # --- parameter prep (done in the wrapper; ideally hoisted/jitted once) ---
    # Fuse the two (L, D) projections into one (L, 2D) matmul.
    wab = jnp.concatenate([wa, wb], axis=1)                     # (L, 2D)
    bab = jnp.concatenate([ba, bb], axis=1).astype(jnp.float32)  # (1, 2D)

    # Lane-dense classifier: pad C up to a multiple of 128.
    C_pad = pl.cdiv(C, 128) * 128
    wc_p = jnp.zeros((D, C_pad), wc.dtype).at[:, :C].set(wc)
    bc_p = jnp.zeros((1, C_pad), jnp.float32).at[:, :C].set(bc.astype(jnp.float32))

    # Pad N to a multiple of the row tile so the grid covers it exactly.
    tn = max(8, tn)
    N_pad = pl.cdiv(N, tn) * tn
    x_p = x if N_pad == N else jnp.pad(x, ((0, N_pad - N), (0, 0)))

    if matmul_dtype is not None:
        # Cast the streamed / resident MXU operands (halves HBM traffic for x).
        x_p = x_p.astype(matmul_dtype)
        wab = wab.astype(matmul_dtype)
        wc_p = wc_p.astype(matmul_dtype)

    grid = (N_pad // tn,)
    itemsize_x = jnp.dtype(x_p.dtype).itemsize
    itemsize_w = jnp.dtype(wab.dtype).itemsize

    cost = pl.CostEstimate(
        flops=2 * N_pad * L * (2 * D) + 2 * N_pad * D * C_pad,
        transcendentals=2 * N_pad * D,
        bytes_accessed=(N_pad * L * itemsize_x                      # x stream
                        + (L * 2 * D + D * C_pad) * itemsize_w      # weights
                        + (2 * D + C_pad) * 4                       # biases
                        + N_pad * C_pad * 4),                       # output
    )

    A_full = pl.pallas_call(
        functools.partial(_gated_attn_kernel, D=D),
        out_shape=jax.ShapeDtypeStruct((N_pad, C_pad), jnp.float32),
        grid=grid,
        in_specs=[
            pl.BlockSpec((tn, L), lambda i: (i, 0)),          # x tile (streamed)
            pl.BlockSpec((L, 2 * D), lambda i: (0, 0)),       # fused Wa|Wb (resident)
            pl.BlockSpec((1, 2 * D), lambda i: (0, 0)),       # fused ba|bb
            pl.BlockSpec((D, C_pad), lambda i: (0, 0)),       # padded Wc
            pl.BlockSpec((1, C_pad), lambda i: (0, 0)),       # padded bc
        ],
        out_specs=pl.BlockSpec((tn, C_pad), lambda i: (i, 0)),
        compiler_params=pltpu.CompilerParams(
            dimension_semantics=("parallel",),                # megacore-friendly
            vmem_limit_bytes=32 * 1024 * 1024,
        ),
        cost_estimate=cost,
    )(x_p, wab, bab, wc_p, bc_p)

    A = A_full[:N, :C]
    # x pass-through (identity), as in the PyTorch forward.
    return A, x


def _reference(x, wa, ba, wb, bb, wc, bc):
    a = jnp.tanh(x @ wa + ba)
    b = jax.nn.sigmoid(x @ wb + bb)
    return (a * b) @ wc + bc


if __name__ == "__main__":
    # Small shapes consistent with the module (defaults L=1024, D=256, C=1,
    # scaled down).  N is deliberately NOT a multiple of the row tile, and the
    # row tile is smaller than N, so padding + the grid path are exercised.
    N, L, D, C = 300, 256, 128, 1
    TN = 128

    key = jax.random.PRNGKey(0)
    kx, ka, kab, kb, kbb, kc, kcb = jax.random.split(key, 7)

    x = jax.random.normal(kx, (N, L), dtype=jnp.float32)

    # Deterministic synthetic parameters, stored as (in, out) = W.T of torch.
    wa = jax.random.normal(ka, (L, D), dtype=jnp.float32) * (1.0 / jnp.sqrt(L))
    ba = jax.random.normal(kab, (1, D), dtype=jnp.float32) * 0.01
    wb = jax.random.normal(kb, (L, D), dtype=jnp.float32) * (1.0 / jnp.sqrt(L))
    bb = jax.random.normal(kbb, (1, D), dtype=jnp.float32) * 0.01
    wc = jax.random.normal(kc, (D, C), dtype=jnp.float32) * (1.0 / jnp.sqrt(D))
    bc = jax.random.normal(kcb, (1, C), dtype=jnp.float32) * 0.01

    A_ref = _reference(x, wa, ba, wb, bb, wc, bc)

    # f32 path (strict check).
    A, x_out = attn_net_gated(x, wa, ba, wb, bb, wc, bc, tn=TN)
    A = jax.block_until_ready(A)
    x_out = jax.block_until_ready(x_out)

    assert A.shape == (N, C)
    assert x_out.shape == (N, L)
    assert jnp.allclose(A, A_ref, atol=1e-4, rtol=1e-4), (
        float(jnp.max(jnp.abs(A - A_ref))))
    assert jnp.allclose(x_out, x)

    # bf16-operand path (f32 accumulation) — loose check.
    A_bf16, _ = attn_net_gated(x, wa, ba, wb, bb, wc, bc, tn=TN,
                               matmul_dtype=jnp.bfloat16)
    A_bf16 = jax.block_until_ready(A_bf16)
    assert A_bf16.shape == (N, C)
    assert jnp.allclose(A_bf16, A_ref, atol=1e-1, rtol=1e-1), (
        float(jnp.max(jnp.abs(A_bf16 - A_ref))))

    print("KERNEL_OK")
</pallas_src>

<mosaic_0001>
module attributes {stable_mosaic.version = 11 : i64} {
  func.func @_gated_attn_kernel(%arg0: i32, %arg1: memref<128x256xf32, #tpu.memory_space<vmem>>, %arg2: memref<256x256xf32, #tpu.memory_space<vmem>>, %arg3: memref<1x256xf32, #tpu.memory_space<vmem>>, %arg4: memref<128x128xf32, #tpu.memory_space<vmem>>, %arg5: memref<1x128xf32, #tpu.memory_space<vmem>>, %arg6: memref<128x128xf32, #tpu.memory_space<vmem>>) attributes {dimension_semantics = [#tpu.dimension_semantics<parallel>], iteration_bounds = array<i64: 3>, scalar_prefetch = 0 : i64, scratch_operands = 0 : i64, tpu.core_type = #tpu.core_type<tc>, window_params = [{transform_indices = @transform_0, window_bounds = array<i64: 128, 256>}, {pipeline_mode = #tpu.pipeline_mode<synchronous>, transform_indices = @transform_1, window_bounds = array<i64: 256, 256>}, {pipeline_mode = #tpu.pipeline_mode<synchronous>, transform_indices = @transform_2, window_bounds = array<i64: 1, 256>}, {pipeline_mode = #tpu.pipeline_mode<synchronous>, transform_indices = @transform_3, window_bounds = array<i64: 128, 128>}, {pipeline_mode = #tpu.pipeline_mode<synchronous>, transform_indices = @transform_4, window_bounds = array<i64: 1, 128>}, {transform_indices = @transform_5, window_bounds = array<i64: 128, 128>}]} {
    %c0 = arith.constant 0 : index
    %c0_0 = arith.constant 0 : index
    %0 = vector.load %arg1[%c0, %c0_0] : memref<128x256xf32, #tpu.memory_space<vmem>>, vector<128x256xf32>
    %c0_1 = arith.constant 0 : index
    %c0_2 = arith.constant 0 : index
    %1 = vector.load %arg2[%c0_1, %c0_2] : memref<256x256xf32, #tpu.memory_space<vmem>>, vector<256x256xf32>
    %cst = arith.constant dense<0.000000e+00> : vector<128x256xf32>
    %2 = tpu.matmul %0, %1, %cst {dimension_numbers = #tpu.dot_dimension_numbers<[1], [0], [0], [1], [0, 0, 1, 1], [], []>} : vector<128x256xf32>, vector<256x256xf32>, vector<128x256xf32> -> vector<128x256xf32>
    %c0_3 = arith.constant 0 : index
    %c0_4 = arith.constant 0 : index
    %3 = vector.load %arg3[%c0_3, %c0_4] : memref<1x256xf32, #tpu.memory_space<vmem>>, vector<1x256xf32>
    %4 = vector.broadcast %3 : vector<1x256xf32> to vector<128x256xf32>
    %5 = arith.addf %2, %4 : vector<128x256xf32>
    %6 = vector.extract_strided_slice %5 {offsets = [0, 0], sizes = [128, 128], strides = [1, 1]} : vector<128x256xf32> to vector<128x128xf32>
    %7 = math.tanh %6 : vector<128x128xf32>
    %8 = vector.extract_strided_slice %5 {offsets = [0, 128], sizes = [128, 128], strides = [1, 1]} : vector<128x256xf32> to vector<128x128xf32>
    %9 = arith.negf %8 : vector<128x128xf32>
    %10 = math.exp %9 : vector<128x128xf32>
    %cst_5 = arith.constant 1.000000e+00 : f32
    %11 = vector.broadcast %cst_5 : f32 to vector<128x128xf32>
    %12 = arith.addf %11, %10 : vector<128x128xf32>
    %13 = arith.divf %11, %12 : vector<128x128xf32>
    %14 = arith.mulf %7, %13 : vector<128x128xf32>
    %c0_6 = arith.constant 0 : index
    %c0_7 = arith.constant 0 : index
    %15 = vector.load %arg4[%c0_6, %c0_7] : memref<128x128xf32, #tpu.memory_space<vmem>>, vector<128x128xf32>
    %cst_8 = arith.constant dense<0.000000e+00> : vector<128x128xf32>
    %16 = tpu.matmul %14, %15, %cst_8 {dimension_numbers = #tpu.dot_dimension_numbers<[1], [0], [0], [1], [0, 0, 1, 1], [], []>} : vector<128x128xf32>, vector<128x128xf32>, vector<128x128xf32> -> vector<128x128xf32>
    %c0_9 = arith.constant 0 : index
    %c0_10 = arith.constant 0 : index
    %17 = vector.load %arg5[%c0_9, %c0_10] : memref<1x128xf32, #tpu.memory_space<vmem>>, vector<1x128xf32>
    %18 = vector.broadcast %17 : vector<1x128xf32> to vector<128x128xf32>
    %19 = arith.addf %16, %18 : vector<128x128xf32>
    %c0_11 = arith.constant 0 : index
    %c0_12 = arith.constant 0 : index
    %20 = vector.load %arg6[%c0_11, %c0_12] : memref<128x128xf32, #tpu.memory_space<vmem>>, vector<128x128xf32>
    tpu.vector_store %arg6[%c0_11, %c0_12], %19 {strides = array<i32>} : memref<128x128xf32, #tpu.memory_space<vmem>>, vector<128x128xf32>,
    return
  }
  func.func @transform_0(%arg0: i32) -> (i32, i32) {
    %c0_i32 = arith.constant 0 : i32
    %c0_i32_0 = arith.constant 0 : i32
    return %arg0, %c0_i32 : i32, i32
  }
  func.func @transform_1(%arg0: i32) -> (i32, i32) {
    %c0_i32 = arith.constant 0 : i32
    %c0_i32_0 = arith.constant 0 : i32
    %c0_i32_1 = arith.constant 0 : i32
    return %c0_i32, %c0_i32_0 : i32, i32
  }
  func.func @transform_2(%arg0: i32) -> (i32, i32) {
    %c0_i32 = arith.constant 0 : i32
    %c0_i32_0 = arith.constant 0 : i32
    %c0_i32_1 = arith.constant 0 : i32
    return %c0_i32, %c0_i32_0 : i32, i32
  }
  func.func @transform_3(%arg0: i32) -> (i32, i32) {
    %c0_i32 = arith.constant 0 : i32
    %c0_i32_0 = arith.constant 0 : i32
    %c0_i32_1 = arith.constant 0 : i32
    return %c0_i32, %c0_i32_0 : i32, i32
  }
  func.func @transform_4(%arg0: i32) -> (i32, i32) {
    %c0_i32 = arith.constant 0 : i32
    %c0_i32_0 = arith.constant 0 : i32
    %c0_i32_1 = arith.constant 0 : i32
    return %c0_i32, %c0_i32_0 : i32, i32
  }
  func.func @transform_5(%arg0: i32) -> (i32, i32) {
    %c0_i32 = arith.constant 0 : i32
    %c0_i32_0 = arith.constant 0 : i32
    return %arg0, %c0_i32 : i32, i32
  }
}

</mosaic_0001>

<bundles_post_ra>
// kernel: tpu_custom_call.1
= control target key start
LH: loop header
LB: loop body
LE: loop exit
PB: predicated region body
PF: predicated region fallthrough
CT: control target
= control target key end

     0   :  { %10 = vsyncpa [#allocation3], 0  ;;  %s1879_s0 = inlined_call_operand.hbm [shape: f32[384,256], index: 0, kind: input, shape index: {}]   ;;  %s1880_s1 = inlined_call_operand.hbm [shape: f32[256,256], index: 1, kind: input, shape index: {}]   ;;  %s1881_s2 = inlined_call_operand.vmem [shape: f32[1,256], index: 2, kind: input, shape index: {}]   ;;  %s1882_s3 = inlined_call_operand.hbm [shape: f32[128,128], index: 3, kind: input, shape index: {}]   ;;  %s1883_s4 = inlined_call_operand.vmem [shape: f32[1,128], index: 4, kind: input, shape index: {}]   ;;  %s1884_s5 = inlined_call_operand.hbm [shape: f32[384,128], index: 5, kind: output, shape index: {}]  }
   0x1   :  { %12 = vsyncpa [#allocation3 + $0x1], 0 }
   0x2   :  { %13 = vsyncpa [#allocation6], 0 }
   0x3   :  { %14 = vsyncpa [#allocation4], 0 }
   0x4   :  { %16 = vsyncpa [#allocation4 + $0x1], 0  ;;  %s1552_s18 = smov 0   ;;  %s1554_s19 = smov 0  }
   0x5   :  { %s1556_s20 = smov 0   ;;  %s1558_s21 = smov 0  }
   0x6 LB: > { %s1573_s22 = sadd.s32 4294967295, %s1510_s21   ;;  %s962_s23 = sadd.s32 4294967294, %s1510_s21   ;;  %s1510_s21 = sphi %s1558_s21, %s1903_s21   ;;  %s1506_s20 = sphi %s1556_s20, %s1902_s20   ;;  %s1502_s19 = sphi %s1554_s19, %s1901_s19   ;;  %s1498_s18 = sphi %s1552_s18, %s1900_s18  }
   0x7   : > { %p42_p0 = scmp.ne.s32.totalorder %s1502_s19, %s1498_s18  ;;  %p1885_p1 = scmp.eq.s32.totalorder %s1573_s22, 0 }
   0x8   : > { %p156_p3 = scmp.eq.s32.totalorder %s962_s23, 2  ;;  %p963_p5 = scmp.ge.s32.totalorder %s1510_s21, 1 }
   0x9   : > { %p1582_p4 = por %p1885_p1, %p42_p0  ;;  %p163_p7 = scmp.lt.s32.totalorder %s1510_s21, 4 }
   0xa   : > { %p1587_p6 = por %p156_p3, %p42_p0  ;;  %s1512_s27 = smov [#allocation5]  }
   0xb   : > { %s1888_s24 = scalar_select %p1582_p4, 1, 0 }
   0xc   : > { %s1889_s25 = scalar_select %p1587_p6, 1, 0 }
   0xd   : > { %p1592_p8 = pnand %p963_p5, %p163_p7  ;;  %s175_s28 = sshll.u32 %s1512_s27, 4  ;;  %s176_s28 = int_to_ptr.vmem [resolvable:$true] %s175_s28 }
   0xe   : > { %s1513_s30 = smov [#allocation7]   ;;  %s1354_s9 = scalar_lea.hbm %s1880_s1, 8192 }
   0xf   : > { %s1890_s26 = scalar_select %p1592_p8, 1, 0 }
  0x10   : > { %p1197_p9 = pneg %p1592_p8  ;;  %s191_s6 = sshll.u32 %s1513_s30, 4  ;;  %s1604_s6 = int_to_ptr.vmem [resolvable:$true] %s191_s6 }
  0x11   : > { %p1355_p11 = scmp.ne.s32.totalorder %s1880_s1, %s1354_s9  ;;  %p1361_p3 = scmp.lt.u32.totalorder %s1354_s9, %s1880_s1 }
  0x12   : > { %p1600_p10 = pnand %p1197_p9, %p1885_p1 }
  0x14   : > { %p1356_p12 = pneg %p1600_p10 }
  0x16   : > { %p1357_p13 = pnand %p1356_p12, %p1355_p11 }
  0x18   : > { %p1358_p0 = pneg %p1357_p13 }
  0x1a   : > { %p1363_p5 = pnand %p1361_p3, %p1358_p0 }
  0x1c   : > { %1366 = shalt.err (!%p1363_p5)
}
  0x1d   : > { %s1367_s14 = scalar_lea.vmem %s176_s28, 8192  ;;  %p1375_p2 = scmp.lt.s32.totalorder %s176_s28, %s176_s28 }
  0x1e   : > { %p1368_p7 = scmp.ne.s32.totalorder %s176_s28, %s1367_s14  ;;  %p1376_p6 = scmp.lt.s32.totalorder %s1367_s14, %s1367_s14 }
  0x20   : > { %p1370_p9 = pnand %p1368_p7, %p1356_p12  ;;  %p1377_p4 = por %p1376_p6, %p1375_p2 }
  0x22   : > { %p1371_p1 = pneg %p1370_p9 }
  0x24   : > { %p1378_p8 = pnand %p1377_p4, %p1371_p1 }
  0x26   : > { %1381 = shalt.err (!%p1378_p8)
}
  0x27   : > { %s1514_s15 = smov 256   ;;  %s1515_s16 = smov 16  }
  0x28   : > { %1200 = dma.hbm_to_vmem [thread:$0]  (!%p1600_p10), %s1880_s1, 8192, %s176_s28, [#allocation6], %s1514_s15, %s1514_s15, %s1515_s16  }
  0x29   : > { %s1382_s7 = scalar_lea.hbm %s1882_s3, 2048 }
  0x2a   : > { %p1383_p1 = scmp.ne.s32.totalorder %s1882_s3, %s1382_s7  ;;  %p1389_p6 = scmp.lt.u32.totalorder %s1382_s7, %s1882_s3 }
  0x2c   : > { %p1385_p2 = pnand %p1383_p1, %p1356_p12 }
  0x2e   : > { %p1386_p4 = pneg %p1385_p2 }
  0x30   : > { %p1391_p8 = pnand %p1389_p6, %p1386_p4 }
  0x32   : > { %1394 = shalt.err (!%p1391_p8)
}
  0x33   : > { %s1395_s28 = scalar_lea.vmem %s1604_s6, 2048  ;;  %p1403_p3 = scmp.lt.s32.totalorder %s1604_s6, %s1604_s6 }
  0x34   : > { %p1396_p11 = scmp.ne.s32.totalorder %s1604_s6, %s1395_s28  ;;  %p1404_p5 = scmp.lt.s32.totalorder %s1395_s28, %s1395_s28 }
  0x36   : > { %p1398_p13 = pnand %p1396_p11, %p1356_p12  ;;  %p1405_p7 = por %p1404_p5, %p1403_p3 }
  0x38   : > { %p1399_p0 = pneg %p1398_p13 }
  0x3a   : > { %p1406_p9 = pnand %p1405_p7, %p1399_p0 }
  0x3c   : > { %1409 = shalt.err (!%p1406_p9)
}
  0x3d   : > { %s1516_s12 = smov 128   ;;  %s1517_s13 = smov 8  }
  0x3e   : > { %1203 = dma.hbm_to_vmem [thread:$0]  (!%p1600_p10), %s1882_s3, 2048, %s1604_s6, [#allocation6], %s1516_s12, %s1516_s12, %s1517_s13  }
  0x3f   : > { %s1657_s23 = sadd.s32 1, %s1510_s21   ;;  %s29_s30 = sadd.s32 1, %s1506_s20 }
  0x40   : > { %s26_s27 = ssub.s32 %s1510_s21, %s1657_s23  ;;  %p36_p1 = scmp.ne.s32.totalorder %s1506_s20, %s1502_s19 }
  0x41   : > { %p27_p12 = scmp.eq.s32.totalorder %s26_s27, 0  ;;  %p37_p2 = scmp.eq.s32.totalorder %s1510_s21, 0 }
  0x42   : > { %p1892_p6 = scmp.eq.s32.totalorder %s1573_s22, 2  ;;  %p1214_p11 = scmp.lt.s32.totalorder %s1510_s21, 3 }
  0x43   : > { %s1666_s7 = scalar_select %p27_p12, %s1506_s20, %s29_s30  }
  0x44   : > { %p38_p4 = por %p37_p2, %p36_p1  ;;  %p1670_p8 = por %p1892_p6, %p36_p1 }
  0x45   : > { %s208_s29 = sand.u32 1, %s1506_s20   ;;  %s999_s6 = sshll.u32 %s1510_s21, 12 }
  0x46   : > { %s967_s9 = sshll.u32 %s208_s29, 8  ;;  %s1680_s28 = scalar_lea.hbm %s1879_s0, %s999_s6 }
  0x47   : > { %s212_s12 = scalar_lea.vmem [#allocation2], %s967_s9  ;;  %p1684_p10 = pnand %p1214_p11, %p38_p4 }
  0x48   : > { %s220_s13 = sshll.u32 %s212_s12, 4  ;;  %s1688_s17 = scalar_lea.sflag [#allocation3], %s208_s29  ;;  %s1682_s13 = int_to_ptr.vmem [resolvable:$true] %s220_s13 }
  0x49   : > { %s1410_s27 = scalar_lea.hbm %s1680_s28, 4096  ;;  %p1412_p0 = pneg %p1684_p10 }
  0x4a   : > { %p1411_p13 = scmp.ne.s32.totalorder %s1680_s28, %s1410_s27  ;;  %s1415_s6 = scalar_lea.hbm %s1879_s0, 12288 }
  0x4b   : > { %p1416_p7 = scmp.lt.u32.totalorder %s1680_s28, %s1879_s0  ;;  %p1417_p9 = scmp.lt.u32.totalorder %s1415_s6, %s1410_s27 }
  0x4c   : > { %p1413_p3 = pnand %p1412_p0, %p1411_p13  ;;  %p1419_p1 = scmp.lt.u32.totalorder %s1410_s27, %s1680_s28 }
  0x4d   : > { %p1418_p12 = por %p1417_p9, %p1416_p7 }
  0x4e   : > { %p1414_p5 = pneg %p1413_p3 }
  0x4f   : > { %p1420_p2 = por %p1419_p1, %p1418_p12 }
  0x51   : > { %p1421_p4 = pnand %p1420_p2, %p1414_p5 }
  0x53   : > { %1424 = shalt.err (!%p1421_p4)
}
  0x54   : > { %s1425_s29 = scalar_lea.vmem %s1682_s13, 4096  ;;  %s1518_s12 = smov [#allocation2]  }
  0x55   : > { %p1426_p6 = scmp.ne.s32.totalorder %s1682_s13, %s1425_s29  ;;  %s1430_s30 = sshll.u32 %s1518_s12, 4  ;;  %s1431_s30 = int_to_ptr.vmem [resolvable:$false] %s1430_s30 }
  0x56   : > { %s1432_s9 = scalar_lea.vmem %s1431_s30, 8192  ;;  %p1433_p3 = scmp.lt.s32.totalorder %s1682_s13, %s1431_s30 }
  0x57   : > { %p1428_p11 = pnand %p1426_p6, %p1412_p0  ;;  %p1434_p7 = scmp.lt.s32.totalorder %s1432_s9, %s1425_s29 }
  0x59   : > { %p1429_p13 = pneg %p1428_p11  ;;  %p1435_p9 = por %p1434_p7, %p1433_p3 }
  0x5b   : > { %p1436_p12 = pnand %p1435_p9, %p1429_p13 }
  0x5d   : > { %1439 = shalt.err (!%p1436_p12)
}
  0x5e   : > { %1207 = dma.hbm_to_vmem [thread:$0]  (!%p1684_p10), %s1680_s28, 4096, %s1682_s13, %s1688_s17, %s1514_s15, %s1514_s15, %s1515_s16  }
  0x5f   : > { %p1895_p0 = scmp.ne.s32.totalorder %s1890_s26, 0 }
  0x60   : > { %s1722_s27 = sand.u32 (!%p1895_p0), 1, %s1502_s19   ;;  %p1896_p5 = scmp.ne.s32.totalorder (!%p1895_p0), %s1888_s24, 0 }
  0x61   : > { %232 = sbr.rel (%p1895_p0) target bundleno = 708 (0x2c4), region = 40  ;;  %s972_s6 = sshll.u32 (!%p1895_p0), %s1722_s27, 8 }
  0x62   : > { %s235_s10 = scalar_lea.sflag (!%p1895_p0), [#allocation3], %s1722_s27  ;;  %s1726_s11 = scalar_lea.vmem (!%p1895_p0), [#allocation2], %s972_s6 }
  0x68   : > { %1485 = dma.done.wait (%p1896_p5), %s235_s10, 4096  }
  0x69   : > { %1487 = vsyncadd (%p1896_p5), %s235_s10, 4294963200  ;;  %p1897_p10 = scmp.eq.s32.totalorder %s1573_s22, 0 }
  0x6b   : > { %1489 = dma.done.wait (%p1897_p10), [#allocation6], 10240   ;;  %p1898_p1 = pmov %p1897_p10 }
  0x6c   : > { %v308_v0 = vld [vmem:[#allocation5 + $0x8] sm:$0xff]  ;;  %v310_v1 = vld [vmem:[#allocation5 + $0x18] sm:$0xff]  ;;  %v307_v2 = vld [vmem:[#allocation5] sm:$0xff]  ;;  %s975_s15 = sshll.u32 %s1722_s27, 7  ;;  %s1000_s14 = sshll.u32 %s1573_s22, 11 }
  0x6d   : > { %1491 = vsyncadd (%p1898_p1), [#allocation6], 4294957056  ;;  %v1089_v3 = vpack.c.bf16 %v310_v1, %v308_v0  ;;  %v309_v4 = vld [vmem:[#allocation5 + $0x10] sm:$0xff]  ;;  %v312_v5 = vld [vmem:[#allocation5 + $0x28] sm:$0xff]  ;;  %s1811_s13 = scalar_lea.vmem [#allocation8], %s975_s15  ;;  %s1832_s30 = scalar_lea.hbm %s1884_s5, %s1000_s14 }
  0x6e   : > { %v314_v6 = vld [vmem:[#allocation5 + $0x38] sm:$0xff]  ;;  %v1091_v7 = vpack.c.bf16 %v309_v4, %v307_v2  ;;  %v311_v9 = vld [vmem:[#allocation5 + $0x20] sm:$0xff]  ;;  %v313_v10 = vld [vmem:[#allocation5 + $0x30] sm:$0xff]  ;;  %s870_s17 = sshll.u32 %s1811_s13, 4  ;;  %s857_s9 = scalar_lea.sflag [#allocation4], %s1722_s27  ;;  %s1834_s17 = int_to_ptr.vmem [resolvable:$true] %s870_s17 }
  0x6f   : > { %v1093_v8 = vpack.c.bf16 %v314_v6, %v312_v5  ;;  %v316_v11 = vld [vmem:[#allocation5 + $0x48] sm:$0xff]  ;;  %1090 = vmatprep.subr.bf16.mxu0 %v1089_v3  ;;  %v318_v12 = vld [vmem:[#allocation5 + $0x58] sm:$0xff]  ;;  %v1095_v13 = vpack.c.bf16 %v313_v10, %v311_v9  ;;  %v315_v15 = vld [vmem:[#allocation5 + $0x40] sm:$0xff]  ;;  %s1440_s6 = scalar_lea.vmem %s1834_s17, 2048  ;;  %s1519_s22 = smov [#allocation8]  }
  0x70   : > { %1092 = vmatpush1.bf16.msra.mxu0 %v1091_v7  ;;  %v1097_v14 = vpack.c.bf16 %v318_v12, %v316_v11  ;;  %v317_v16 = vld [vmem:[#allocation5 + $0x50] sm:$0xff]  ;;  %v320_v17 = vld [vmem:[#allocation5 + $0x68] sm:$0xff]  ;;  %v322_v18 = vld [vmem:[#allocation5 + $0x78] sm:$0xff]  ;;  %p1441_p2 = scmp.ne.s32.totalorder %s1834_s17, %s1440_s6  ;;  %s1444_s10 = sshll.u32 %s1519_s22, 4  ;;  %s1445_s10 = int_to_ptr.vmem [resolvable:$false] %s1444_s10 }
  0x71   : > { %1094 = vmatprep.subr.bf16.mxu0 %v1093_v8  ;;  %v1099_v19 = vpack.c.bf16 %v317_v16, %v315_v15  ;;  %v1101_v20 = vpack.c.bf16 %v322_v18, %v320_v17  ;;  %v319_v21 = vld [vmem:[#allocation5 + $0x60] sm:$0xff]  ;;  %v321_v22 = vld [vmem:[#allocation5 + $0x70] sm:$0xff]  ;;  %v324_v23 = vld [vmem:[#allocation5 + $0x88] sm:$0xff]  ;;  %p1447_p11 = scmp.lt.s32.totalorder %s1834_s17, %s1445_s10 }
  0x72   : > { %v326_v24 = vld [vmem:[#allocation5 + $0x98] sm:$0xff]  ;;  %v1103_v25 = vpack.c.bf16 %v321_v22, %v319_v21  ;;  %v323_v27 = vld [vmem:[#allocation5 + $0x80] sm:$0xff]  ;;  %v325_v28 = vld [vmem:[#allocation5 + $0x90] sm:$0xff]  ;;  %p1442_p4 = pnand %p1441_p2, %p1670_p8 }
  0x73   : > { %v1105_v26 = vpack.c.bf16 %v326_v24, %v324_v23  ;;  %v328_v29 = vld [vmem:[#allocation5 + $0xa8] sm:$0xff]  ;;  %v330_v30 = vld [vmem:[#allocation5 + $0xb8] sm:$0xff]  ;;  %v1107_v31 = vpack.c.bf16 %v325_v28, %v323_v27  ;;  %v327_v33 = vld [vmem:[#allocation5 + $0xa0] sm:$0xff] }
  0x74   : > { %1096 = vmatpush1.bf16.msra.mxu0 %v1095_v13  ;;  %v1109_v32 = vpack.c.bf16 %v330_v30, %v328_v29  ;;  %v329_v34 = vld [vmem:[#allocation5 + $0xb0] sm:$0xff]  ;;  %v332_v35 = vld [vmem:[#allocation5 + $0xc8] sm:$0xff]  ;;  %v334_v36 = vld [vmem:[#allocation5 + $0xd8] sm:$0xff]  ;;  %p1443_p6 = pneg %p1442_p4 }
  0x75   : > { %1098 = vmatprep.subr.bf16.mxu0 %v1097_v14  ;;  %v1111_v37 = vpack.c.bf16 %v329_v34, %v327_v33  ;;  %v1113_v38 = vpack.c.bf16 %v334_v36, %v332_v35  ;;  %v331_v39 = vld [vmem:[#allocation5 + $0xc0] sm:$0xff]  ;;  %v333_v40 = vld [vmem:[#allocation5 + $0xd0] sm:$0xff]  ;;  %v276_v41 = vld [vmem:[%s1726_s11 + $0x8] sm:$0xff] }
  0x76   : > { %v336_v42 = vld [vmem:[#allocation5 + $0xe8] sm:$0xff]  ;;  %v338_v43 = vld [vmem:[#allocation5 + $0xf8] sm:$0xff]  ;;  %447 = vmatprep.mubr.f32.mxu0 %v276_v41  ;;  %v1115_v44 = vpack.c.bf16 %v333_v40, %v331_v39  ;;  %v335_v46 = vld [vmem:[#allocation5 + $0xe0] sm:$0xff] }
  0x77   : > { %v1117_v45 = vpack.c.bf16 %v338_v43, %v336_v42  ;;  %v337_v47 = vld [vmem:[#allocation5 + $0xf0] sm:$0xff]  ;;  %v340_v48 = vld [vmem:[#allocation5 + $0x108] sm:$0xff]  ;;  %v342_v49 = vld [vmem:[#allocation5 + $0x118] sm:$0xff] }
  0x78   : > { %1100 = vmatpush1.bf16.msra.mxu0 %v1099_v19  ;;  %v1119_v50 = vpack.c.bf16 %v337_v47, %v335_v46  ;;  %v1121_v51 = vpack.c.bf16 %v342_v49, %v340_v48  ;;  %v339_v52 = vld [vmem:[#allocation5 + $0x100] sm:$0xff]  ;;  %v341_v53 = vld [vmem:[#allocation5 + $0x110] sm:$0xff]  ;;  %v344_v54 = vld [vmem:[#allocation5 + $0x128] sm:$0xff] }
  0x79   : > { %1102 = vmatprep.subr.bf16.mxu0 %v1101_v20  ;;  %v346_v55 = vld [vmem:[#allocation5 + $0x138] sm:$0xff]  ;;  %v1123_v56 = vpack.c.bf16 %v341_v53, %v339_v52  ;;  %v343_v58 = vld [vmem:[#allocation5 + $0x120] sm:$0xff]  ;;  %v345_v59 = vld [vmem:[#allocation5 + $0x130] sm:$0xff] }
  0x7a   : > { %v1125_v57 = vpack.c.bf16 %v346_v55, %v344_v54  ;;  %v348_v60 = vld [vmem:[#allocation5 + $0x148] sm:$0xff]  ;;  %v350_v61 = vld [vmem:[#allocation5 + $0x158] sm:$0xff]  ;;  %v1127_v62 = vpack.c.bf16 %v345_v59, %v343_v58  ;;  %v347_v0 = vld [vmem:[#allocation5 + $0x140] sm:$0xff] }
  0x7b   : > { %v1129_v63 = vpack.c.bf16 %v350_v61, %v348_v60  ;;  %v349_v1 = vld [vmem:[#allocation5 + $0x150] sm:$0xff]  ;;  %v352_v2 = vld [vmem:[#allocation5 + $0x168] sm:$0xff]  ;;  %v354_v3 = vld [vmem:[#allocation5 + $0x178] sm:$0xff] }
  0x7c   : > { %1104 = vmatpush1.bf16.msra.mxu0 %v1103_v25  ;;  %v1131_v4 = vpack.c.bf16 %v349_v1, %v347_v0  ;;  %v1133_v5 = vpack.c.bf16 %v354_v3, %v352_v2  ;;  %v351_v6 = vld [vmem:[#allocation5 + $0x160] sm:$0xff]  ;;  %v353_v7 = vld [vmem:[#allocation5 + $0x170] sm:$0xff]  ;;  %v356_v8 = vld [vmem:[#allocation5 + $0x188] sm:$0xff] }
  0x7d   : > { %1106 = vmatprep.subr.bf16.mxu0 %v1105_v26  ;;  %v358_v9 = vld [vmem:[#allocation5 + $0x198] sm:$0xff]  ;;  %v1135_v10 = vpack.c.bf16 %v353_v7, %v351_v6  ;;  %v355_v12 = vld [vmem:[#allocation5 + $0x180] sm:$0xff]  ;;  %v357_v13 = vld [vmem:[#allocation5 + $0x190] sm:$0xff] }
  0x7e   : > { %v1137_v11 = vpack.c.bf16 %v358_v9, %v356_v8  ;;  %v360_v14 = vld [vmem:[#allocation5 + $0x1a8] sm:$0xff]  ;;  %v362_v15 = vld [vmem:[#allocation5 + $0x1b8] sm:$0xff]  ;;  %v1139_v16 = vpack.c.bf16 %v357_v13, %v355_v12  ;;  %v359_v18 = vld [vmem:[#allocation5 + $0x1a0] sm:$0xff] }
  0x7f   : > { %v1141_v17 = vpack.c.bf16 %v362_v15, %v360_v14  ;;  %v361_v19 = vld [vmem:[#allocation5 + $0x1b0] sm:$0xff]  ;;  %v364_v20 = vld [vmem:[#allocation5 + $0x1c8] sm:$0xff]  ;;  %v366_v21 = vld [vmem:[#allocation5 + $0x1d8] sm:$0xff] }
  0x80   : > { %1108 = vmatpush1.bf16.msra.mxu0 %v1107_v31  ;;  %v1143_v22 = vpack.c.bf16 %v361_v19, %v359_v18  ;;  %v1145_v23 = vpack.c.bf16 %v366_v21, %v364_v20  ;;  %v363_v24 = vld [vmem:[#allocation5 + $0x1c0] sm:$0xff]  ;;  %v365_v25 = vld [vmem:[#allocation5 + $0x1d0] sm:$0xff]  ;;  %v368_v26 = vld [vmem:[#allocation5 + $0x1e8] sm:$0xff] }
  0x81   : > { %1110 = vmatprep.subr.bf16.mxu0 %v1109_v32  ;;  %v370_v27 = vld [vmem:[#allocation5 + $0x1f8] sm:$0xff]  ;;  %v1147_v28 = vpack.c.bf16 %v365_v25, %v363_v24  ;;  %v367_v30 = vld [vmem:[#allocation5 + $0x1e0] sm:$0xff]  ;;  %v369_v31 = vld [vmem:[#allocation5 + $0x1f0] sm:$0xff]  ;;  %v373_v24 = vlaneseq }
  0x82   : > { %v1149_v29 = vpack.c.bf16 %v370_v27, %v368_v26  ;;  %v1151_v32 = vpack.c.bf16 %v369_v31, %v367_v30  ;;  %v275_v33 = vld [vmem:[%s1726_s11] sm:$0xff]  ;;  %v278_v34 = vld [vmem:[%s1726_s11 + $0x18] sm:$0xff]  ;;  %v277_v35 = vld [vmem:[%s1726_s11 + $0x10] sm:$0xff] }
  0x83   : > { %v280_v36 = vld [vmem:[%s1726_s11 + $0x28] sm:$0xff]  ;;  %v281_v39 = vld [vmem:[%s1726_s11 + $0x30] sm:$0xff]  ;;  %v283_v41 = vld [vmem:[%s1726_s11 + $0x40] sm:$0xff]  ;;  %v374_v25 = vshrl.u32 %v373_v24, 7 }
  0x84   : > { %1112 = vmatpush1.bf16.msra.mxu0 %v1111_v37  ;;  %v279_v37 = vld [vmem:[%s1726_s11 + $0x20] sm:$0xff]  ;;  %v284_v40 = vld [vmem:[%s1726_s11 + $0x48] sm:$0xff]  ;;  %v286_v42 = vld [vmem:[%s1726_s11 + $0x58] sm:$0xff] }
  0x85   : > { %1114 = vmatprep.subr.bf16.mxu0 %v1113_v38  ;;  %v282_v38 = vld [vmem:[%s1726_s11 + $0x38] sm:$0xff]  ;;  %v285_v43 = vld [vmem:[%s1726_s11 + $0x50] sm:$0xff]  ;;  %v292_v48 = vld [vmem:[%s1726_s11 + $0x88] sm:$0xff]  ;;  %v379_v26 = vsub.s32 1, %v374_v25 }
  0x86   : > { %v290_v46 = vld [vmem:[%s1726_s11 + $0x78] sm:$0xff]  ;;  %v289_v47 = vld [vmem:[%s1726_s11 + $0x70] sm:$0xff]  ;;  %v291_v49 = vld [vmem:[%s1726_s11 + $0x80] sm:$0xff] }
  0x87   : > { %v296_v52 = vld [vmem:[%s1726_s11 + $0xa8] sm:$0xff]  ;;  %v295_v53 = vld [vmem:[%s1726_s11 + $0xa0] sm:$0xff]  ;;  %v298_v54 = vld [vmem:[%s1726_s11 + $0xb8] sm:$0xff] }
  0x88   : > { %1116 = vmatpush1.bf16.msra.mxu0 %v1115_v44  ;;  %v288_v44 = vld [vmem:[%s1726_s11 + $0x68] sm:$0xff]  ;;  %v297_v55 = vld [vmem:[%s1726_s11 + $0xb0] sm:$0xff]  ;;  %v302_v58 = vld [vmem:[%s1726_s11 + $0xd8] sm:$0xff] }
  0x89   : > { %1118 = vmatprep.subr.bf16.mxu0 %v1117_v45  ;;  %v287_v45 = vld [vmem:[%s1726_s11 + $0x60] sm:$0xff]  ;;  %v301_v59 = vld [vmem:[%s1726_s11 + $0xd0] sm:$0xff]  ;;  %v304_v60 = vld [vmem:[%s1726_s11 + $0xe8] sm:$0xff] }
  0x8a   : > { %v303_v61 = vld [vmem:[%s1726_s11 + $0xe0] sm:$0xff]  ;;  %v673_v1 = vld [vmem:[#allocation7 + $0x8] sm:$0xff]  ;;  %v674_v3 = vld [vmem:[#allocation7 + $0x10] sm:$0xff] }
  0x8b   : > { %v672_v0 = vld [vmem:[#allocation7] sm:$0xff]  ;;  %v677_v7 = vld [vmem:[#allocation7 + $0x28] sm:$0xff]  ;;  %v678_v9 = vld [vmem:[#allocation7 + $0x30] sm:$0xff] }
  0x8c   : > { %1120 = vmatpush1.bf16.msra.mxu0 %v1119_v50  ;;  %v294_v50 = vld [vmem:[%s1726_s11 + $0x98] sm:$0xff]  ;;  %v1153_v2 = vpack.c.bf16 %v673_v1, %v672_v0  ;;  %v676_v6 = vld [vmem:[#allocation7 + $0x20] sm:$0xff]  ;;  %v681_v13 = vld [vmem:[#allocation7 + $0x48] sm:$0xff] }
  0x8d   : > { %1122 = vmatprep.subr.bf16.mxu0 %v1121_v51  ;;  %v293_v51 = vld [vmem:[%s1726_s11 + $0x90] sm:$0xff]  ;;  %v1161_v8 = vpack.c.bf16 %v677_v7, %v676_v6  ;;  %v680_v12 = vld [vmem:[#allocation7 + $0x40] sm:$0xff]  ;;  %v685_v19 = vld [vmem:[#allocation7 + $0x68] sm:$0xff] }
  0x8e   : > { %1154 = vmatprep.subr.bf16.mxu1 %v1153_v2  ;;  %v1169_v14 = vpack.c.bf16 %v681_v13, %v680_v12  ;;  %v682_v15 = vld [vmem:[#allocation7 + $0x50] sm:$0xff]  ;;  %v684_v18 = vld [vmem:[#allocation7 + $0x60] sm:$0xff] }
  0x8f   : > { %1156 = vmatpush3.bf16.msra.mxu1 %v1153_v2  ;;  %v1177_v20 = vpack.c.bf16 %v685_v19, %v684_v18  ;;  %v686_v21 = vld [vmem:[#allocation7 + $0x70] sm:$0xff]  ;;  %v371_v27 = vld [vmem:[%s1881_s2] sm:$0x3] }
  0x90   : > { %1124 = vmatpush1.bf16.msra.mxu0 %v1123_v56  ;;  %v300_v56 = vld [vmem:[%s1726_s11 + $0xc8] sm:$0xff] }
  0x91   : > { %1126 = vmatprep.subr.bf16.mxu0 %v1125_v57  ;;  %v299_v57 = vld [vmem:[%s1726_s11 + $0xc0] sm:$0xff] }
  0x94   : > { %1128 = vmatpush1.bf16.msra.mxu0 %v1127_v62  ;;  %v306_v62 = vld [vmem:[%s1726_s11 + $0xf8] sm:$0xff] }
  0x95   : > { %1130 = vmatprep.subr.bf16.mxu0 %v1129_v63  ;;  %v305_v63 = vld [vmem:[%s1726_s11 + $0xf0] sm:$0xff]  ;;  %s1446_s11 = scalar_lea.vmem %s1445_s10, 4096 }
  0x96   : > { %p1448_p13 = scmp.lt.s32.totalorder %s1446_s11, %s1440_s6 }
  0x98   : > { %1132 = vmatpush1.bf16.msra.mxu0 %v1131_v4  ;;  %v675_v4 = vld [vmem:[#allocation7 + $0x18] sm:$0xff]  ;;  %p1449_p3 = por %p1448_p13, %p1447_p11 }
  0x99   : > { %1134 = vmatprep.subr.bf16.mxu0 %v1133_v5  ;;  %v1157_v5 = vpack.c.bf16 %v675_v4, %v674_v3 }
  0x9a   : > { %p1450_p7 = pnand %p1449_p3, %p1443_p6 }
  0x9b   : > { %1158 = vmatprep.subr.bf16.mxu1 %v1157_v5 }
  0x9c   : > { %1136 = vmatpush1.bf16.msra.mxu0 %v1135_v10  ;;  %1160 = vmatpush3.bf16.msra.mxu1 %v1157_v5  ;;  %v679_v10 = vld [vmem:[#allocation7 + $0x38] sm:$0xff] }
  0x9d   : > { %1138 = vmatprep.subr.bf16.mxu0 %v1137_v11  ;;  %1162 = vmatprep.subr.bf16.mxu1 %v1161_v8  ;;  %v1165_v11 = vpack.c.bf16 %v679_v10, %v678_v9 }
  0xa0   : > { %1140 = vmatpush1.bf16.msra.mxu0 %v1139_v16  ;;  %1164 = vmatpush3.bf16.msra.mxu1 %v1161_v8  ;;  %v683_v16 = vld [vmem:[#allocation7 + $0x58] sm:$0xff] }
  0xa1   : > { %1142 = vmatprep.subr.bf16.mxu0 %v1141_v17  ;;  %1166 = vmatprep.subr.bf16.mxu1 %v1165_v11  ;;  %v1173_v17 = vpack.c.bf16 %v683_v16, %v682_v15 }
  0xa4   : > { %1144 = vmatpush1.bf16.msra.mxu0 %v1143_v22  ;;  %1168 = vmatpush3.bf16.msra.mxu1 %v1165_v11  ;;  %v687_v22 = vld [vmem:[#allocation7 + $0x78] sm:$0xff] }
  0xa5   : > { %1146 = vmatprep.subr.bf16.mxu0 %v1145_v23  ;;  %1170 = vmatprep.subr.bf16.mxu1 %v1169_v14  ;;  %v1181_v23 = vpack.c.bf16 %v687_v22, %v686_v21 }
  0xa8   : > { %1148 = vmatpush1.bf16.msra.mxu0 %v1147_v28  ;;  %1172 = vmatpush3.bf16.msra.mxu1 %v1169_v14  ;;  %v1771_v28 = vrot.slane %v371_v27, %v379_v26 }
  0xa9   : > { %1150 = vmatprep.subr.bf16.mxu0 %v1149_v29  ;;  %1174 = vmatprep.subr.bf16.mxu1 %v1173_v17 }
  0xac   : > { %1152 = vmatpush1.bf16.msra.mxu0 %v1151_v32  ;;  %1176 = vmatpush3.bf16.msra.mxu1 %v1173_v17 }
  0xad   : > { %1178 = vmatprep.subr.bf16.mxu1 %v1177_v20 }
  0xaf   : > { %448 = vmatmul.mubr.f32.vlgmr.msra.gmra.mrb[0].mxu0 %v275_v33 }
  0xb0   : > { %453 = vmatprep.mubr.f32.mxu0 %v278_v34  ;;  %1180 = vmatpush3.bf16.msra.mxu1 %v1177_v20  ;;  %v375_v34 = vsub.s32 0, %v374_v25 }
  0xb1   : > { %1182 = vmatprep.subr.bf16.mxu1 %v1181_v23 }
  0xb3   : > { %454 = vmatmul.mubr.f32.gmra.mrb[2].mxu0 %v277_v35 }
  0xb4   : > { %459 = vmatprep.mubr.f32.mxu0 %v280_v36  ;;  %1184 = vmatpush3.bf16.msra.mxu1 %v1181_v23 }
  0xb7   : > { %460 = vmatmul.mubr.f32.gmra.mrb[4].mxu0 %v279_v37 }
  0xb8   : > { %465 = vmatprep.mubr.f32.mxu0 %v282_v38 }
  0xbb   : > { %466 = vmatmul.mubr.f32.gmra.mrb[6].mxu0 %v281_v39  ;;  %v1775_v39 = vrot.slane %v371_v27, %v375_v34 }
  0xbc   : > { %471 = vmatprep.mubr.f32.mxu0 %v284_v40 }
  0xbf   : > { %472 = vmatmul.mubr.f32.gmra.mrb[8].mxu0 %v283_v41 }
  0xc0   : > { %477 = vmatprep.mubr.f32.mxu0 %v286_v42 }
  0xc3   : > { %478 = vmatmul.mubr.f32.gmra.mrb[10].mxu0 %v285_v43 }
  0xc4   : > { %483 = vmatprep.mubr.f32.mxu0 %v288_v44 }
  0xc7   : > { %484 = vmatmul.mubr.f32.gmra.mrb[12].mxu0 %v287_v45 }
  0xc8   : > { %489 = vmatprep.mubr.f32.mxu0 %v290_v46 }
  0xcb   : > { %490 = vmatmul.mubr.f32.gmra.mrb[14].mxu0 %v289_v47 }
  0xcc   : > { %495 = vmatprep.mubr.f32.mxu0 %v292_v48 }
  0xcf   : > { %496 = vmatmul.mubr.f32.gmra.mrb[16].mxu0 %v291_v49 }
  0xd0   : > { %501 = vmatprep.mubr.f32.mxu0 %v294_v50 }
  0xd3   : > { %502 = vmatmul.mubr.f32.gmra.mrb[18].mxu0 %v293_v51 }
  0xd4   : > { %507 = vmatprep.mubr.f32.mxu0 %v296_v52 }
  0xd7   : > { %508 = vmatmul.mubr.f32.gmra.mrb[20].mxu0 %v295_v53 }
  0xd8   : > { %513 = vmatprep.mubr.f32.mxu0 %v298_v54 }
  0xdb   : > { %514 = vmatmul.mubr.f32.gmra.mrb[22].mxu0 %v297_v55 }
  0xdc   : > { %519 = vmatprep.mubr.f32.mxu0 %v300_v56 }
  0xdf   : > { %520 = vmatmul.mubr.f32.gmra.mrb[24].mxu0 %v299_v57 }
  0xe0   : > { %525 = vmatprep.mubr.f32.mxu0 %v302_v58 }
  0xe3   : > { %526 = vmatmul.mubr.f32.gmra.mrb[26].mxu0 %v301_v59 }
  0xe4   : > { %531 = vmatprep.mubr.f32.mxu0 %v304_v60 }
  0xe7   : > { %532 = vmatmul.mubr.f32.gmra.mrb[28].mxu0 %v303_v61 }
  0xe8   : > { %537 = vmatprep.mubr.f32.mxu0 %v306_v62 }
  0xeb   : > { %538 = vmatmul.mubr.f32.gmra.mrb[30].mxu0 %v305_v63 }
 0x182   : > { %v449_v29 = vpop.f32.mrb[0].mxu0 }
 0x183   : > { %v451_v30 = vpop.f32.mrb[1].mxu0  ;;  %v450_v44 = vadd.f32 %v449_v29, %v1775_v39 }
 0x184   : > { %v452_v31 = vadd.f32 %v451_v30, %v1771_v28 }
 0x186   : > { %v976_v32 = vmul.f32 -1.442695, %v452_v31  ;;  %v455_v33 = vpop.f32.mrb[2].mxu0 }
 0x187   : > { %v457_v35 = vpop.f32.mrb[3].mxu0  ;;  %v456_v51 = vadd.f32 %v455_v33, %v1775_v39 }
 0x188   : > { %1258 = vpow2.f32 %v976_v32  ;;  %v458_v36 = vadd.f32 %v457_v35, %v1771_v28 }
 0x18a   : > { %v977_v37 = vmul.f32 -1.442695, %v458_v36  ;;  %v461_v38 = vpop.f32.mrb[4].mxu0 }
 0x18b   : > { %v463_v40 = vpop.f32.mrb[5].mxu0  ;;  %v462_v58 = vadd.f32 %v461_v38, %v1775_v39 }
 0x18c   : > { %1260 = vpow2.f32 %v977_v37  ;;  %v464_v41 = vadd.f32 %v463_v40, %v1771_v28 }
 0x18e   : > { %v978_v42 = vmul.f32 -1.442695, %v464_v41  ;;  %v467_v43 = vpop.f32.mrb[6].mxu0 }
 0x18f   : > { %v469_v45 = vpop.f32.mrb[7].mxu0  ;;  %v468_v1 = vadd.f32 %v467_v43, %v1775_v39 }
 0x190   : > { %1262 = vpow2.f32 %v978_v42  ;;  %v470_v46 = vadd.f32 %v469_v45, %v1771_v28 }
 0x191   : > { %1264 = vtanh.f32 %v450_v44 }
 0x192   : > { %v1259_v47 = vpop.eup %1258  ;;  %v979_v48 = vmul.f32 -1.442695, %v470_v46  ;;  %v473_v49 = vpop.f32.mrb[8].mxu0 }
 0x193   : > { %v608_v50 = vadd.f32 1.0, %v1259_v47  ;;  %v475_v52 = vpop.f32.mrb[9].mxu0  ;;  %v474_v10 = vadd.f32 %v473_v49, %v1775_v39 }
 0x194   : > { %1266 = vpow2.f32 %v979_v48  ;;  %v476_v53 = vadd.f32 %v475_v52, %v1771_v28 }
 0x195   : > { %1268 = vrcp.f32 %v608_v50 }
 0x196   : > { %v1261_v54 = vpop.eup %1260  ;;  %v980_v55 = vmul.f32 -1.442695, %v476_v53  ;;  %v479_v56 = vpop.f32.mrb[10].mxu0  ;;  %1270 = vtanh.f32 %v456_v51 }
 0x197   : > { %v609_v57 = vadd.f32 1.0, %v1261_v54  ;;  %v481_v59 = vpop.f32.mrb[11].mxu0  ;;  %v480_v20 = vadd.f32 %v479_v56, %v1775_v39 }
 0x198   : > { %1272 = vpow2.f32 %v980_v55  ;;  %v482_v60 = vadd.f32 %v481_v59, %v1771_v28 }
 0x199   : > { %1274 = vrcp.f32 %v609_v57 }
 0x19a   : > { %v1263_v61 = vpop.eup %1262  ;;  %v981_v62 = vmul.f32 -1.442695, %v482_v60  ;;  %v485_v63 = vpop.f32.mrb[12].mxu0  ;;  %1276 = vtanh.f32 %v462_v58 }
 0x19b   : > { %v610_v0 = vadd.f32 1.0, %v1263_v61  ;;  %v487_v2 = vpop.f32.mrb[13].mxu0  ;;  %v1265_v4 = vpop.eup %1264  ;;  %v486_v31 = vadd.f32 %v485_v63, %v1775_v39 }
 0x19c   : > { %1278 = vpow2.f32 %v981_v62  ;;  %v488_v3 = vadd.f32 %v487_v2, %v1771_v28 }
 0x19d   : > { %1280 = vrcp.f32 %v610_v0 }
 0x19e   : > { %v1267_v5 = vpop.eup %1266  ;;  %v982_v6 = vmul.f32 -1.442695, %v488_v3  ;;  %v491_v7 = vpop.f32.mrb[14].mxu0  ;;  %1282 = vtanh.f32 %v468_v1 }
 0x19f   : > { %v1269_v8 = vpop.eup %1268  ;;  %v611_v9 = vadd.f32 1.0, %v1267_v5  ;;  %v493_v11 = vpop.f32.mrb[15].mxu0  ;;  %v492_v42 = vadd.f32 %v491_v7, %v1775_v39 }
 0x1a0   : > { %1284 = vpow2.f32 %v982_v6  ;;  %v494_v12 = vadd.f32 %v493_v11, %v1771_v28  ;;  %v656_v13 = vmul.f32 %v1269_v8, %v1265_v4  ;;  %v1271_v14 = vpop.eup %1270 }
 0x1a1   : > { %1286 = vrcp.f32 %v611_v9 }
 0x1a2   : > { %v1273_v15 = vpop.eup %1272  ;;  %v983_v16 = vmul.f32 -1.442695, %v494_v12  ;;  %v497_v17 = vpop.f32.mrb[16].mxu0  ;;  %1065 = vmatprep.mubr.f32.mxu1 %v656_v13  ;;  %1288 = vtanh.f32 %v474_v10 }
 0x1a3   : > { %v1275_v18 = vpop.eup %1274  ;;  %v612_v19 = vadd.f32 1.0, %v1273_v15  ;;  %v499_v21 = vpop.f32.mrb[17].mxu0  ;;  %v498_v52 = vadd.f32 %v497_v17, %v1775_v39 }
 0x1a4   : > { %1290 = vpow2.f32 %v983_v16  ;;  %v500_v22 = vadd.f32 %v499_v21, %v1771_v28  ;;  %v657_v23 = vmul.f32 %v1275_v18, %v1271_v14  ;;  %v1277_v24 = vpop.eup %1276 }
 0x1a5   : > { %1292 = vrcp.f32 %v612_v19 }
 0x1a6   : > { %v1279_v25 = vpop.eup %1278  ;;  %v984_v26 = vmul.f32 -1.442695, %v500_v22  ;;  %v503_v27 = vpop.f32.mrb[18].mxu0  ;;  %1066 = vmatmul.mubr.f32.vlgmr.msra.gmra.mrb[0].mxu1 %v657_v23  ;;  %1294 = vtanh.f32 %v480_v20 }
 0x1a7   : > { %v1281_v29 = vpop.eup %1280  ;;  %v613_v30 = vadd.f32 1.0, %v1279_v25  ;;  %v505_v32 = vpop.f32.mrb[19].mxu0  ;;  %v504_v62 = vadd.f32 %v503_v27, %v1775_v39 }
 0x1a8   : > { %1296 = vpow2.f32 %v984_v26  ;;  %v506_v33 = vadd.f32 %v505_v32, %v1771_v28  ;;  %v658_v34 = vmul.f32 %v1281_v29, %v1277_v24  ;;  %v1283_v35 = vpop.eup %1282 }
 0x1a9   : > { %1298 = vrcp.f32 %v613_v30 }
 0x1aa   : > { %v1285_v36 = vpop.eup %1284  ;;  %v985_v37 = vmul.f32 -1.442695, %v506_v33  ;;  %v509_v38 = vpop.f32.mrb[20].mxu0  ;;  %1068 = vmatprep.mubr.f32.mxu1 %v658_v34  ;;  %1300 = vtanh.f32 %v486_v31 }
 0x1ab   : > { %v1287_v40 = vpop.eup %1286  ;;  %v614_v41 = vadd.f32 1.0, %v1285_v36  ;;  %v511_v43 = vpop.f32.mrb[21].mxu0  ;;  %v510_v8 = vadd.f32 %v509_v38, %v1775_v39 }
 0x1ac   : > { %1302 = vpow2.f32 %v985_v37  ;;  %v512_v44 = vadd.f32 %v511_v43, %v1771_v28  ;;  %v659_v45 = vmul.f32 %v1287_v40, %v1283_v35  ;;  %v1289_v46 = vpop.eup %1288 }
 0x1ad   : > { %1304 = vrcp.f32 %v614_v41 }
 0x1ae   : > { %v1291_v47 = vpop.eup %1290  ;;  %v986_v48 = vmul.f32 -1.442695, %v512_v44  ;;  %v515_v49 = vpop.f32.mrb[22].mxu0  ;;  %1069 = vmatmul.mubr.f32.gmra.mrb[2].mxu1 %v659_v45  ;;  %1306 = vtanh.f32 %v492_v42 }
 0x1af   : > { %v1293_v50 = vpop.eup %1292  ;;  %v615_v51 = vadd.f32 1.0, %v1291_v47  ;;  %v517_v53 = vpop.f32.mrb[23].mxu0  ;;  %v516_v18 = vadd.f32 %v515_v49, %v1775_v39 }
 0x1b0   : > { %1308 = vpow2.f32 %v986_v48  ;;  %v518_v54 = vadd.f32 %v517_v53, %v1771_v28  ;;  %v660_v55 = vmul.f32 %v1293_v50, %v1289_v46  ;;  %v1295_v56 = vpop.eup %1294 }
 0x1b1   : > { %1310 = vrcp.f32 %v615_v51 }
 0x1b2   : > { %v1297_v57 = vpop.eup %1296  ;;  %v987_v58 = vmul.f32 -1.442695, %v518_v54  ;;  %v521_v59 = vpop.f32.mrb[24].mxu0  ;;  %1071 = vmatprep.mubr.f32.mxu1 %v660_v55  ;;  %1312 = vtanh.f32 %v498_v52 }
 0x1b3   : > { %v1299_v60 = vpop.eup %1298  ;;  %v616_v61 = vadd.f32 1.0, %v1297_v57  ;;  %v523_v63 = vpop.f32.mrb[25].mxu0  ;;  %v522_v29 = vadd.f32 %v521_v59, %v1775_v39 }
 0x1b4   : > { %1314 = vpow2.f32 %v987_v58  ;;  %v524_v0 = vadd.f32 %v523_v63, %v1771_v28  ;;  %v661_v1 = vmul.f32 %v1299_v60, %v1295_v56  ;;  %v1301_v2 = vpop.eup %1300 }
 0x1b5   : > { %1316 = vrcp.f32 %v616_v61 }
 0x1b6   : > { %v1303_v3 = vpop.eup %1302  ;;  %v988_v4 = vmul.f32 -1.442695, %v524_v0  ;;  %v527_v5 = vpop.f32.mrb[26].mxu0  ;;  %1072 = vmatmul.mubr.f32.gmra.mrb[4].mxu1 %v661_v1  ;;  %1318 = vtanh.f32 %v504_v62  ;;  %v992_v1 = vld [vmem:[%s1883_s4] ss:$0 sm:$0xff] }
 0x1b7   : > { %v1305_v6 = vpop.eup %1304  ;;  %v617_v7 = vadd.f32 1.0, %v1303_v3  ;;  %v529_v9 = vpop.f32.mrb[27].mxu0  ;;  %v528_v38 = vadd.f32 %v527_v5, %v1775_v39 }
 0x1b8   : > { %1320 = vpow2.f32 %v988_v4  ;;  %v530_v10 = vadd.f32 %v529_v9, %v1771_v28  ;;  %v662_v11 = vmul.f32 %v1305_v6, %v1301_v2  ;;  %v1307_v12 = vpop.eup %1306 }
 0x1b9   : > { %1322 = vrcp.f32 %v617_v7 }
 0x1ba   : > { %v1309_v13 = vpop.eup %1308  ;;  %v989_v14 = vmul.f32 -1.442695, %v530_v10  ;;  %v533_v15 = vpop.f32.mrb[28].mxu0  ;;  %1074 = vmatprep.mubr.f32.mxu1 %v662_v11  ;;  %1324 = vtanh.f32 %v510_v8 }
 0x1bb   : > { %v1311_v16 = vpop.eup %1310  ;;  %v618_v17 = vadd.f32 1.0, %v1309_v13  ;;  %v535_v19 = vpop.f32.mrb[29].mxu0 }
 0x1bc   : > { %1326 = vpow2.f32 %v989_v14  ;;  %v536_v20 = vadd.f32 %v535_v19, %v1771_v28  ;;  %v663_v21 = vmul.f32 %v1311_v16, %v1307_v12  ;;  %v1313_v22 = vpop.eup %1312 }
 0x1bd   : > { %1328 = vrcp.f32 %v618_v17 }
 0x1be   : > { %v1315_v23 = vpop.eup %1314  ;;  %v990_v24 = vmul.f32 -1.442695, %v536_v20  ;;  %v539_v25 = vpop.f32.mrb[30].mxu0  ;;  %1075 = vmatmul.mubr.f32.gmra.mrb[6].mxu1 %v663_v21  ;;  %1330 = vtanh.f32 %v516_v18 }
 0x1bf   : > { %v1317_v26 = vpop.eup %1316  ;;  %v619_v27 = vadd.f32 1.0, %v1315_v23  ;;  %v541_v30 = vpop.f32.mrb[31].mxu0  ;;  %v540_v50 = vadd.f32 %v539_v25, %v1775_v39 }
 0x1c0   : > { %1332 = vpow2.f32 %v990_v24  ;;  %v542_v31 = vadd.f32 %v541_v30, %v1771_v28  ;;  %v664_v32 = vmul.f32 %v1317_v26, %v1313_v22  ;;  %v1319_v33 = vpop.eup %1318  ;;  %v534_v28 = vadd.f32 %v533_v15, %v1775_v39 }
 0x1c1   : > { %1334 = vrcp.f32 %v619_v27 }
 0x1c2   : > { %v1321_v34 = vpop.eup %1320  ;;  %v991_v35 = vmul.f32 -1.442695, %v542_v31  ;;  %1077 = vmatprep.mubr.f32.mxu1 %v664_v32  ;;  %1336 = vtanh.f32 %v522_v29 }
 0x1c3   : > { %v1323_v36 = vpop.eup %1322  ;;  %v620_v37 = vadd.f32 1.0, %v1321_v34 }
 0x1c4   : > { %1338 = vpow2.f32 %v991_v35  ;;  %v665_v40 = vmul.f32 %v1323_v36, %v1319_v33  ;;  %v1325_v41 = vpop.eup %1324 }
 0x1c5   : > { %1340 = vrcp.f32 %v620_v37 }
 0x1c6   : > { %v1327_v42 = vpop.eup %1326  ;;  %1078 = vmatmul.mubr.f32.gmra.mrb[8].mxu1 %v665_v40  ;;  %1342 = vtanh.f32 %v528_v38 }
 0x1c7   : > { %v1329_v43 = vpop.eup %1328  ;;  %v621_v44 = vadd.f32 1.0, %v1327_v42 }
 0x1c8   : > { %v666_v45 = vmul.f32 %v1329_v43, %v1325_v41  ;;  %v1331_v46 = vpop.eup %1330 }
 0x1c9   : > { %1344 = vrcp.f32 %v621_v44 }
 0x1ca   : > { %v1333_v47 = vpop.eup %1332  ;;  %1080 = vmatprep.mubr.f32.mxu1 %v666_v45  ;;  %1346 = vtanh.f32 %v534_v28 }
 0x1cb   : > { %v1335_v48 = vpop.eup %1334  ;;  %v622_v49 = vadd.f32 1.0, %v1333_v47 }
 0x1cc   : > { %v667_v51 = vmul.f32 %v1335_v48, %v1331_v46  ;;  %v1337_v52 = vpop.eup %1336 }
 0x1cd   : > { %1348 = vrcp.f32 %v622_v49 }
 0x1ce   : > { %v1339_v53 = vpop.eup %1338  ;;  %1081 = vmatmul.mubr.f32.gmra.mrb[10].mxu1 %v667_v51  ;;  %1350 = vtanh.f32 %v540_v50 }
 0x1cf   : > { %v1341_v54 = vpop.eup %1340  ;;  %v623_v55 = vadd.f32 1.0, %v1339_v53 }
 0x1d0   : > { %v668_v56 = vmul.f32 %v1341_v54, %v1337_v52  ;;  %v1343_v57 = vpop.eup %1342 }
 0x1d1   : > { %1352 = vrcp.f32 %v623_v55 }
 0x1d2   : > { %1083 = vmatprep.mubr.f32.mxu1 %v668_v56 }
 0x1d3   : > { %v1345_v58 = vpop.eup %1344 }
 0x1d4   : > { %v669_v59 = vmul.f32 %v1345_v58, %v1343_v57  ;;  %v1347_v60 = vpop.eup %1346 }
 0x1d6   : > { %1084 = vmatmul.mubr.f32.gmra.mrb[12].mxu1 %v669_v59 }
 0x1d7   : > { %v1349_v61 = vpop.eup %1348 }
 0x1d8   : > { %v670_v62 = vmul.f32 %v1349_v61, %v1347_v60  ;;  %v1351_v39 = vpop.eup %1350 }
 0x1da   : > { %1086 = vmatprep.mubr.f32.mxu1 %v670_v62 }
 0x1db   : > { %v1353_v63 = vpop.eup %1352 }
 0x1dc   : > { %v671_v0 = vmul.f32 %v1353_v63, %v1351_v39 }
 0x1de   : > { %1087 = vmatmul.mubr.f32.gmra.mrb[14].mxu1 %v671_v0 }
 0x279   : > { %v1067_v2 = vpop.f32.mrb[0].mxu1 }
 0x27a   : > { %v767_v3 = vadd.f32 %v1067_v2, %v992_v1  ;;  %v761_v4 = vpop.f32.mrb[1].mxu1 }
 0x27b   : > { %v762_v5 = vadd.f32 %v992_v1, %v761_v4 }
 0x27c   : > { %841 = vst [vmem:[%s1811_s13 + $0x8] sm:$0xff] %v767_v3 }
 0x27d   : > { %840 = vst [vmem:[%s1811_s13] sm:$0xff] %v762_v5 }
 0x281   : > { %v1070_v6 = vpop.f32.mrb[2].mxu1 }
 0x282   : > { %v777_v7 = vadd.f32 %v1070_v6, %v992_v1  ;;  %v771_v8 = vpop.f32.mrb[3].mxu1 }
 0x283   : > { %v772_v9 = vadd.f32 %v992_v1, %v771_v8 }
 0x284   : > { %843 = vst [vmem:[%s1811_s13 + $0x18] sm:$0xff] %v777_v7 }
 0x285   : > { %842 = vst [vmem:[%s1811_s13 + $0x10] sm:$0xff] %v772_v9 }
 0x289   : > { %v1073_v10 = vpop.f32.mrb[4].mxu1 }
 0x28a   : > { %v787_v11 = vadd.f32 %v1073_v10, %v992_v1  ;;  %v781_v12 = vpop.f32.mrb[5].mxu1 }
 0x28b   : > { %v782_v13 = vadd.f32 %v992_v1, %v781_v12 }
 0x28c   : > { %845 = vst [vmem:[%s1811_s13 + $0x28] sm:$0xff] %v787_v11 }
 0x28d   : > { %844 = vst [vmem:[%s1811_s13 + $0x20] sm:$0xff] %v782_v13 }
 0x291   : > { %v1076_v14 = vpop.f32.mrb[6].mxu1 }
 0x292   : > { %v797_v15 = vadd.f32 %v1076_v14, %v992_v1  ;;  %v791_v16 = vpop.f32.mrb[7].mxu1 }
 0x293   : > { %v792_v17 = vadd.f32 %v992_v1, %v791_v16 }
 0x294   : > { %847 = vst [vmem:[%s1811_s13 + $0x38] sm:$0xff] %v797_v15 }
 0x295   : > { %846 = vst [vmem:[%s1811_s13 + $0x30] sm:$0xff] %v792_v17 }
 0x299   : > { %v1079_v18 = vpop.f32.mrb[8].mxu1 }
 0x29a   : > { %v807_v19 = vadd.f32 %v1079_v18, %v992_v1  ;;  %v801_v20 = vpop.f32.mrb[9].mxu1 }
 0x29b   : > { %v802_v21 = vadd.f32 %v992_v1, %v801_v20 }
 0x29c   : > { %849 = vst [vmem:[%s1811_s13 + $0x48] sm:$0xff] %v807_v19 }
 0x29d   : > { %848 = vst [vmem:[%s1811_s13 + $0x40] sm:$0xff] %v802_v21 }
 0x2a1   : > { %v1082_v22 = vpop.f32.mrb[10].mxu1 }
 0x2a2   : > { %v817_v23 = vadd.f32 %v1082_v22, %v992_v1  ;;  %v811_v24 = vpop.f32.mrb[11].mxu1 }
 0x2a3   : > { %v812_v25 = vadd.f32 %v992_v1, %v811_v24 }
 0x2a4   : > { %851 = vst [vmem:[%s1811_s13 + $0x58] sm:$0xff] %v817_v23 }
 0x2a5   : > { %850 = vst [vmem:[%s1811_s13 + $0x50] sm:$0xff] %v812_v25 }
 0x2a9   : > { %v1085_v26 = vpop.f32.mrb[12].mxu1 }
 0x2aa   : > { %v827_v27 = vadd.f32 %v1085_v26, %v992_v1  ;;  %v821_v29 = vpop.f32.mrb[13].mxu1 }
 0x2ab   : > { %v822_v30 = vadd.f32 %v992_v1, %v821_v29 }
 0x2ac   : > { %853 = vst [vmem:[%s1811_s13 + $0x68] sm:$0xff] %v827_v27 }
 0x2ad   : > { %852 = vst [vmem:[%s1811_s13 + $0x60] sm:$0xff] %v822_v30 }
 0x2b1   : > { %v1088_v31 = vpop.f32.mrb[14].mxu1 }
 0x2b2   : > { %v837_v32 = vadd.f32 %v1088_v31, %v992_v1  ;;  %v831_v33 = vpop.f32.mrb[15].mxu1 }
 0x2b3   : > { %v832_v34 = vadd.f32 %v992_v1, %v831_v33 }
 0x2b4   : > { %855 = vst [vmem:[%s1811_s13 + $0x78] sm:$0xff] %v837_v32 }
 0x2b5   : > { %854 = vst [vmem:[%s1811_s13 + $0x70] sm:$0xff] %v832_v34 }
 0x2b6   : > { %1453 = shalt.err (!%p1450_p7)
}
 0x2b7   : > { %s1454_s24 = scalar_lea.hbm %s1832_s30, 2048  ;;  %s1458_s16 = scalar_lea.hbm %s1884_s5, 6144 }
 0x2b8   : > { %p1455_p9 = scmp.ne.s32.totalorder %s1832_s30, %s1454_s24  ;;  %p1459_p5 = scmp.lt.u32.totalorder %s1832_s30, %s1884_s5 }
 0x2b9   : > { %p1460_p10 = scmp.lt.u32.totalorder %s1458_s16, %s1454_s24  ;;  %p1462_p2 = scmp.lt.u32.totalorder %s1454_s24, %s1832_s30 }
 0x2ba   : > { %p1456_p12 = pnand %p1455_p9, %p1670_p8 }
 0x2bb   : > { %p1461_p1 = por %p1460_p10, %p1459_p5 }
 0x2bc   : > { %p1457_p0 = pneg %p1456_p12 }
 0x2bd   : > { %p1463_p4 = por %p1462_p2, %p1461_p1 }
 0x2bf   : > { %p1464_p6 = pnand %p1463_p4, %p1457_p0 }
 0x2c1   : > { %1467 = shalt.err (!%p1464_p6)
}
 0x2c2   : > { %s1520_s14 = smov 128   ;;  %s1521_s29 = smov 8  }
 0x2c3   : > { %1195 = dma.vmem_to_hbm [thread:$0]  (%p1670_p8), %s1834_s17, 2048, %s1832_s30, %s857_s9, %s1520_s14, %s1520_s14, %s1521_s29  }
 0x2c4 PF: > { %p1217_p11 = scmp.ge.s32.totalorder %s1510_s21, 2  ;;  %s885_s12 = sand.u32 1, %s1498_s18  }
 0x2c5   : > { %p1899_p13 = scmp.ne.s32.totalorder %s1889_s25, 0  ;;  %s886_s6 = scalar_lea.sflag [#allocation4], %s885_s12 }
 0x2c7   : > { %p1209_p3 = pnand %p1217_p11, %p1899_p13 }
 0x2c9   : > { %1493 = dma.done.wait (!%p1209_p3), %s886_s6, 2048  }
 0x2ca   : > { %1495 = vsyncadd (!%p1209_p3), %s886_s6, 4294965248  ;;  %p19_p7 = scmp.ge.s32.totalorder %s1657_s23, 5   ;;  %s1900_s18 = smov %s1502_s19 }
 0x2cb   : > { %s1901_s19 = smov %s1506_s20  ;;  %s1902_s20 = smov %s1666_s7 }
 0x2cc   : > { %s1903_s21 = smov %s1657_s23  ;;  %21 = sbr.rel (!%p19_p7) target bundleno = 6 (0x6), region = 93 }
 0x2d3   :  { %891 = vsyncpa [#allocation3], 1 }
 0x2d4   :  { %893 = vsyncpa [#allocation3 + $0x1], 1 }
 0x2d5   :  { %894 = vsyncpa [#allocation6], 1 }
 0x2d6   :  { %895 = vsyncpa [#allocation4], 1 }
 0x2d7   :  { %897 = vsyncpa [#allocation4 + $0x1], 1 }

</bundles_post_ra>
